<compile_context>
chip_gen: v7x
topology: tpu7x:2x2x1
jax: 0.10.0
libtpu: 0.0.40
codegen_flags: <defaults>
</compile_context>

<pallas_src>
import functools

import numpy as np
import jax
import jax.numpy as jnp
from jax.experimental import pallas as pl
from jax.experimental.pallas import tpu as pltpu


# ----------------------------------------------------------------------------
# Pallas kernel: fused  Linear(512,256) -> ReLU -> (Dropout=id) -> Linear(256,128)
# x arrives f32 (single HBM pass), cast to bf16 at the MXU boundary; weights bf16;
# accumulation, biases and output stay f32.
# ----------------------------------------------------------------------------
def ocr_feature_mlp_kernel(x_ref, w1_ref, b1_ref, w2_ref, b2_ref, o_ref):
    x = x_ref[...].astype(jnp.bfloat16)                              # [tm, 512] bf16
    h = jnp.dot(x, w1_ref[...],
                preferred_element_type=jnp.float32) + b1_ref[...]    # [tm, 256] f32
    h = jnp.maximum(h, 0.0)                                          # ReLU
    # Dropout(0.1) is identity in eval mode.
    out = jnp.dot(h.astype(jnp.bfloat16), w2_ref[...],
                  preferred_element_type=jnp.float32) + b2_ref[...]  # [tm, 128] f32
    o_ref[...] = out.astype(o_ref.dtype)


def _round_up(x, m):
    return ((x + m - 1) // m) * m


def _tensorcores_per_chip():
    """2 on v7x (megacore split helps), 1 on v5e/v6e. Safe fallback to 1."""
    try:
        kind = jax.devices()[0].device_kind.lower()
    except Exception:
        return 1
    return 2 if ("v7" in kind or "7x" in kind) else 1


@functools.partial(jax.jit, static_argnames=("tile_m", "num_cores"))
def _ocr_feature_extractor_impl(x, w1_bf, b1, w2_bf, b2, *, tile_m, num_cores):
    B, _ = x.shape
    # Pad only to a 16-row (bf16 sublane) boundary, NOT to a full tile.
    B_pad = _round_up(B, 16)
    tm = min(tile_m, B_pad)
    # v7x: keep >=2 grid steps so both TensorCores get work; no-op on 1-TC chips.
    if num_cores >= 2 and B_pad > 16:
        tm = min(tm, max(16, _round_up(pl.cdiv(B_pad, num_cores), 16)))
    if B_pad != B:
        x = jnp.pad(x, ((0, B_pad - B), (0, 0)))
    grid = (pl.cdiv(B_pad, tm),)   # trailing partial block handled by Pallas masking

    out = pl.pallas_call(
        ocr_feature_mlp_kernel,
        out_shape=jax.ShapeDtypeStruct((B_pad, 128), jnp.float32),
        grid_spec=pltpu.PrefetchScalarGridSpec(
            num_scalar_prefetch=0,
            grid=grid,
            in_specs=[
                pl.BlockSpec((tm, 512), lambda i: (i, 0)),    # x tile (pipelined)
                pl.BlockSpec((512, 256), lambda i: (0, 0)),   # w1 resident across steps
                pl.BlockSpec((1, 256), lambda i: (0, 0)),     # b1 resident
                pl.BlockSpec((256, 128), lambda i: (0, 0)),   # w2 resident
                pl.BlockSpec((1, 128), lambda i: (0, 0)),     # b2 resident
            ],
            out_specs=pl.BlockSpec((tm, 128), lambda i: (i, 0)),
        ),
        compiler_params=pltpu.CompilerParams(
            dimension_semantics=("parallel",),   # shard batch across v7x's 2 TCs
        ),
    )(x, w1_bf, b1, w2_bf, b2)
    return out[:B]


def ocr_feature_extractor(x, prepared_params, *, tile_m=1024):
    """x: [B, 512] float32 -> [B, 128] float32 via one jitted, batch-tiled Pallas call."""
    w1_bf, b1, w2_bf, b2 = prepared_params
    return _ocr_feature_extractor_impl(
        x, w1_bf, b1, w2_bf, b2, tile_m=tile_m, num_cores=_tensorcores_per_chip())


# ----------------------------------------------------------------------------
# Glue: deterministic parameter init (matches nn.Linear shapes) and the
# host-side "OCR" feature construction (steps 1-2 of the PyTorch forward).
# ----------------------------------------------------------------------------
def init_params(key):
    k1, k2, k3, k4 = jax.random.split(key, 4)
    # nn.Linear default init: U(-1/sqrt(fan_in), 1/sqrt(fan_in))
    lim1 = 1.0 / np.sqrt(512.0)
    lim2 = 1.0 / np.sqrt(256.0)
    w1 = jax.random.uniform(k1, (512, 256), jnp.float32, -lim1, lim1)
    b1 = jax.random.uniform(k2, (1, 256), jnp.float32, -lim1, lim1)
    w2 = jax.random.uniform(k3, (256, 128), jnp.float32, -lim2, lim2)
    b2 = jax.random.uniform(k4, (1, 128), jnp.float32, -lim2, lim2)
    return w1, b1, w2, b2


def prepare_params(params):
    """One-time bf16 cast of the matmul weights (biases stay f32)."""
    w1, b1, w2, b2 = params
    return (w1.astype(jnp.bfloat16), b1, w2.astype(jnp.bfloat16), b2)


def build_ocr_feature_512(pseudo_results):
    """Emulates OCREncoder._extract_ocr_feature up to (but not including) the MLP."""
    feature = np.zeros(512, dtype=np.float32)
    if not pseudo_results:
        return feature
    text_feats, box_feats = [], []
    for r in pseudo_results:
        counts = np.zeros(256, dtype=np.float32)
        for c in r['text']:
            if ord(c) < 256:
                counts[ord(c)] += 1.0
        text_feats.append(counts)
        xs = [p[0] for p in r['box']]
        ys = [p[1] for p in r['box']]
        box_feats.append(np.array(
            [sum(xs) / 4.0, sum(ys) / 4.0, max(xs) - min(xs), max(ys) - min(ys)],
            dtype=np.float32))
    feature[:256] = np.stack(text_feats).mean(axis=0)
    feature[256:260] = np.stack(box_feats).mean(axis=0)
    return feature


def _pseudo_ocr_results(i):
    pseudo_texts = ["hello 123", "ocr test", "pallas tpu", "kernel"]
    return [
        {'text': pseudo_texts[i % len(pseudo_texts)],
         'box': [(1.0 + i, 2.0), (9.0 + i, 2.0), (9.0 + i, 6.0), (1.0 + i, 6.0)]},
        {'text': pseudo_texts[(i + 1) % len(pseudo_texts)],
         'box': [(0.0, 8.0), (12.0, 8.0), (12.0, 14.0 + i), (0.0, 14.0 + i)]},
    ]


def ocr_encoder_forward(images, prepared_params):
    """Full OCREncoder.forward equivalent.

    images: [B, C, H, W] float32 — only consumed by the (untranslatable) OCR stage,
    which is replaced by deterministic pseudo-results. Returns [B, 128] float32.
    """
    # TODO(synk): cv2 preprocessing + PaddleOCR/easyocr recognition has no Pallas
    # equivalent; deterministic pseudo-OCR results are used per image instead.
    B = images.shape[0]
    feats = [build_ocr_feature_512(_pseudo_ocr_results(i)) for i in range(B)]
    # Single stacked feature matrix -> one jitted Pallas launch for the whole batch.
    x = jnp.asarray(np.stack(feats), dtype=jnp.float32)   # [B, 512]
    return ocr_feature_extractor(x, prepared_params)       # [B, 128]


if __name__ == "__main__":
    key = jax.random.PRNGKey(0)
    k_img, k_params = jax.random.split(key)

    # Small input consistent with the module's forward signature (NCHW).
    images = jax.random.uniform(k_img, (2, 3, 16, 16), jnp.float32)

    params_f32 = init_params(k_params)
    params = prepare_params(params_f32)

    out = ocr_encoder_forward(images, params)
    out = jax.block_until_ready(out)

    assert out.shape == (2, 128), out.shape
    assert out.dtype == jnp.float32, out.dtype
    assert bool(jnp.all(jnp.isfinite(out)))

    # Correctness sanity check vs. a pure-JAX f32 reference (bf16 MXU inputs,
    # f32 accumulation -> expect ~1e-2 relative tolerance).
    w1, b1, w2, b2 = params_f32
    feats = [build_ocr_feature_512(_pseudo_ocr_results(i)) for i in range(2)]
    x_ref = jnp.asarray(np.stack(feats), dtype=jnp.float32)
    ref = jnp.maximum(x_ref @ w1 + b1, 0.0) @ w2 + b2
    np.testing.assert_allclose(np.asarray(out), np.asarray(ref), rtol=2e-2, atol=2e-2)

    print("KERNEL_OK")
</pallas_src>

<mosaic_0001>
module attributes {stable_mosaic.version = 11 : i64} {
  func.func @ocr_feature_mlp_kernel(%arg0: i32, %arg1: memref<16x512xf32, #tpu.memory_space<vmem>>, %arg2: memref<512x256xbf16, #tpu.memory_space<vmem>>, %arg3: memref<1x256xf32, #tpu.memory_space<vmem>>, %arg4: memref<256x128xbf16, #tpu.memory_space<vmem>>, %arg5: memref<1x128xf32, #tpu.memory_space<vmem>>, %arg6: memref<16x128xf32, #tpu.memory_space<vmem>>) attributes {dimension_semantics = [#tpu.dimension_semantics<parallel>], iteration_bounds = array<i64: 1>, scalar_prefetch = 0 : i64, scratch_operands = 0 : i64, tpu.core_type = #tpu.core_type<tc>, window_params = [{transform_indices = @transform_0, window_bounds = array<i64: 16, 512>}, {pipeline_mode = #tpu.pipeline_mode<synchronous>, transform_indices = @transform_1, window_bounds = array<i64: 512, 256>}, {pipeline_mode = #tpu.pipeline_mode<synchronous>, transform_indices = @transform_2, window_bounds = array<i64: 1, 256>}, {pipeline_mode = #tpu.pipeline_mode<synchronous>, transform_indices = @transform_3, window_bounds = array<i64: 256, 128>}, {pipeline_mode = #tpu.pipeline_mode<synchronous>, transform_indices = @transform_4, window_bounds = array<i64: 1, 128>}, {transform_indices = @transform_5, window_bounds = array<i64: 16, 128>}]} {
    %c0 = arith.constant 0 : index
    %c0_0 = arith.constant 0 : index
    %0 = vector.load %arg1[%c0, %c0_0] : memref<16x512xf32, #tpu.memory_space<vmem>>, vector<16x512xf32>
    %1 = arith.truncf %0 : vector<16x512xf32> to vector<16x512xbf16>
    %c0_1 = arith.constant 0 : index
    %c0_2 = arith.constant 0 : index
    %2 = vector.load %arg2[%c0_1, %c0_2] : memref<512x256xbf16, #tpu.memory_space<vmem>>, vector<512x256xbf16>
    %cst = arith.constant dense<0.000000e+00> : vector<16x256xf32>
    %3 = tpu.matmul %1, %2, %cst {dimension_numbers = #tpu.dot_dimension_numbers<[1], [0], [0], [1], [0, 0, 1, 1], [], []>} : vector<16x512xbf16>, vector<512x256xbf16>, vector<16x256xf32> -> vector<16x256xf32>
    %c0_3 = arith.constant 0 : index
    %c0_4 = arith.constant 0 : index
    %4 = vector.load %arg3[%c0_3, %c0_4] : memref<1x256xf32, #tpu.memory_space<vmem>>, vector<1x256xf32>
    %5 = vector.broadcast %4 : vector<1x256xf32> to vector<16x256xf32>
    %6 = arith.addf %3, %5 : vector<16x256xf32>
    %cst_5 = arith.constant 0.000000e+00 : f32
    %7 = vector.broadcast %cst_5 : f32 to vector<16x256xf32>
    %8 = arith.maximumf %6, %7 : vector<16x256xf32>
    %9 = arith.truncf %8 : vector<16x256xf32> to vector<16x256xbf16>
    %c0_6 = arith.constant 0 : index
    %c0_7 = arith.constant 0 : index
    %10 = vector.load %arg4[%c0_6, %c0_7] : memref<256x128xbf16, #tpu.memory_space<vmem>>, vector<256x128xbf16>
    %cst_8 = arith.constant dense<0.000000e+00> : vector<16x128xf32>
    %11 = tpu.matmul %9, %10, %cst_8 {dimension_numbers = #tpu.dot_dimension_numbers<[1], [0], [0], [1], [0, 0, 1, 1], [], []>} : vector<16x256xbf16>, vector<256x128xbf16>, vector<16x128xf32> -> vector<16x128xf32>
    %c0_9 = arith.constant 0 : index
    %c0_10 = arith.constant 0 : index
    %12 = vector.load %arg5[%c0_9, %c0_10] : memref<1x128xf32, #tpu.memory_space<vmem>>, vector<1x128xf32>
    %13 = vector.broadcast %12 : vector<1x128xf32> to vector<16x128xf32>
    %14 = arith.addf %11, %13 : vector<16x128xf32>
    %c0_11 = arith.constant 0 : index
    %c0_12 = arith.constant 0 : index
    %15 = vector.load %arg6[%c0_11, %c0_12] : memref<16x128xf32, #tpu.memory_space<vmem>>, vector<16x128xf32>
    tpu.vector_store %arg6[%c0_11, %c0_12], %14 {strides = array<i32>} : memref<16x128xf32, #tpu.memory_space<vmem>>, vector<16x128xf32>,
    return
  }
  func.func @transform_0(%arg0: i32) -> (i32, i32) {
    %c0_i32 = arith.constant 0 : i32
    %c0_i32_0 = arith.constant 0 : i32
    return %arg0, %c0_i32 : i32, i32
  }
  func.func @transform_1(%arg0: i32) -> (i32, i32) {
    %c0_i32 = arith.constant 0 : i32
    %c0_i32_0 = arith.constant 0 : i32
    %c0_i32_1 = arith.constant 0 : i32
    return %c0_i32, %c0_i32_0 : i32, i32
  }
  func.func @transform_2(%arg0: i32) -> (i32, i32) {
    %c0_i32 = arith.constant 0 : i32
    %c0_i32_0 = arith.constant 0 : i32
    %c0_i32_1 = arith.constant 0 : i32
    return %c0_i32, %c0_i32_0 : i32, i32
  }
  func.func @transform_3(%arg0: i32) -> (i32, i32) {
    %c0_i32 = arith.constant 0 : i32
    %c0_i32_0 = arith.constant 0 : i32
    %c0_i32_1 = arith.constant 0 : i32
    return %c0_i32, %c0_i32_0 : i32, i32
  }
  func.func @transform_4(%arg0: i32) -> (i32, i32) {
    %c0_i32 = arith.constant 0 : i32
    %c0_i32_0 = arith.constant 0 : i32
    %c0_i32_1 = arith.constant 0 : i32
    return %c0_i32, %c0_i32_0 : i32, i32
  }
  func.func @transform_5(%arg0: i32) -> (i32, i32) {
    %c0_i32 = arith.constant 0 : i32
    %c0_i32_0 = arith.constant 0 : i32
    return %arg0, %c0_i32 : i32, i32
  }
}

</mosaic_0001>

<bundles_post_ra>
// kernel: _ocr_feature_extractor_impl.1
= control target key start
LH: loop header
LB: loop body
LE: loop exit
PB: predicated region body
PF: predicated region fallthrough
CT: control target
= control target key end

     0   :  { %10 = vsyncpa [#allocation3], 0  ;;  %s1106_s0 = inlined_call_operand.vmem [shape: f32[16,512], index: 0, kind: input, shape index: {}]   ;;  %s1107_s1 = inlined_call_operand.hbm [shape: bf16[512,256], index: 1, kind: input, shape index: {}]   ;;  %s1108_s2 = inlined_call_operand.vmem [shape: f32[1,256], index: 2, kind: input, shape index: {}]   ;;  %s1109_s3 = inlined_call_operand.hbm [shape: bf16[256,128], index: 3, kind: input, shape index: {}]   ;;  %s1110_s4 = inlined_call_operand.vmem [shape: f32[1,128], index: 4, kind: input, shape index: {}]   ;;  %s1111_s5 = inlined_call_operand.vmem [shape: f32[16,128], index: 5, kind: output, shape index: {}]  }
   0x1   :  { %11 = vsyncpa [#allocation5], 0  ;;  %s1010_s18 = smov [#allocation2]   ;;  %s962_s22 = scalar_lea.hbm %s1107_s1, 8192 }
   0x2   :  { %s19_s19 = sshll.u32 %s1010_s18, 4  ;;  %p963_p0 = scmp.ne.s32.totalorder %s1107_s1, %s962_s22  ;;  %s20_s19 = int_to_ptr.vmem [resolvable:$true] %s19_s19 }
   0x3   :  { %p966_p1 = scmp.lt.u32.totalorder %s962_s22, %s1107_s1 }
   0x5   :  { %p968_p2 = pnand %p966_p1, %p963_p0 }
   0x7   :  { %971 = shalt.err (!%p968_p2)
}
   0x8   :  { %s972_s27 = scalar_lea.vmem %s20_s19, 8192  ;;  %p977_p4 = scmp.lt.s32.totalorder %s20_s19, %s20_s19 }
   0x9   :  { %p973_p3 = scmp.ne.s32.totalorder %s20_s19, %s972_s27  ;;  %p978_p5 = scmp.lt.s32.totalorder %s972_s27, %s972_s27 }
   0xb   :  { %p979_p6 = por %p978_p5, %p977_p4 }
   0xd   :  { %p980_p7 = pnand %p979_p6, %p973_p3 }
   0xf   :  { %983 = shalt.err (!%p980_p7)
}
  0x10   :  { %s1011_s28 = smov 128   ;;  %s1012_s29 = smov 8  }
  0x11   :  { %25 = dma.hbm_to_vmem [thread:$0]  %s1107_s1, 8192, %s20_s19, [#allocation3], %s1011_s28, %s1011_s28, %s1012_s29  }
  0x12   :  { %s1013_s7 = smov [#allocation4]   ;;  %s984_s11 = scalar_lea.hbm %s1109_s3, 2048 }
  0x13   :  { %s33_s8 = sshll.u32 %s1013_s7, 4  ;;  %p985_p8 = scmp.ne.s32.totalorder %s1109_s3, %s984_s11  ;;  %s34_s8 = int_to_ptr.vmem [resolvable:$true] %s33_s8 }
  0x14   :  { %p988_p9 = scmp.lt.u32.totalorder %s984_s11, %s1109_s3 }
  0x16   :  { %p990_p10 = pnand %p988_p9, %p985_p8 }
  0x18   :  { %993 = shalt.err (!%p990_p10)
}
  0x19   :  { %s994_s16 = scalar_lea.vmem %s34_s8, 2048  ;;  %p999_p12 = scmp.lt.s32.totalorder %s34_s8, %s34_s8 }
  0x1a   :  { %p995_p11 = scmp.ne.s32.totalorder %s34_s8, %s994_s16  ;;  %p1000_p13 = scmp.lt.s32.totalorder %s994_s16, %s994_s16 }
  0x1c   :  { %p1001_p0 = por %p1000_p13, %p999_p12 }
  0x1e   :  { %p1002_p1 = pnand %p1001_p0, %p995_p11 }
  0x20   :  { %1005 = shalt.err (!%p1002_p1)
}
  0x21   :  { %s1014_s1 = smov 64   ;;  %s1015_s17 = smov 4  }
  0x22   :  { %39 = dma.hbm_to_vmem [thread:$0]  %s1109_s3, 2048, %s34_s8, [#allocation5], %s1014_s1, %s1014_s1, %s1015_s17  }
  0x23   :  { %1006 = dma.done.wait [#allocation3], 8192  }
  0x24   :  { %1007 = vsyncadd [#allocation3], 4294959104 }
  0x25   :  { %1008 = dma.done.wait [#allocation5], 2048  }
  0x26   :  { %1009 = vsyncadd [#allocation5], 4294965248  ;;  %v850_v0 = vld [vmem:[#allocation2 + $0x4] ss:$8 sps:$4 sm:$0xff]   ;;  %v854_v2 = vld [vmem:[#allocation2] ss:$8 sps:$4 sm:$0xff]  }
  0x27   :  { %v852_v1 = vld [vmem:[#allocation2 + $0x104] ss:$8 sps:$4 sm:$0xff]   ;;  %457 = vmatprep.subr.bf16.mxu1 %v850_v0  ;;  %v855_v3 = vld [vmem:[#allocation2 + $0x100] ss:$8 sps:$4 sm:$0xff]   ;;  %v856_v4 = vld [vmem:[#allocation2 + $0x14] ss:$8 sps:$4 sm:$0xff]  }
  0x28   :  { %500 = vmatprep.subr.bf16.mxu0 %v852_v1  ;;  %458 = vmatpush1.bf16.msra.mxu1 %v854_v2  ;;  %v858_v5 = vld [vmem:[#allocation2 + $0x114] ss:$8 sps:$4 sm:$0xff]   ;;  %v860_v6 = vld [vmem:[#allocation2 + $0x10] ss:$8 sps:$4 sm:$0xff]   ;;  %v862_v8 = vld [vmem:[#allocation2 + $0x24] ss:$8 sps:$4 sm:$0xff]  }
  0x29   :  { %501 = vmatpush1.bf16.msra.mxu0 %v855_v3  ;;  %459 = vmatprep.subr.bf16.mxu1 %v856_v4  ;;  %v861_v7 = vld [vmem:[#allocation2 + $0x110] ss:$8 sps:$4 sm:$0xff]   ;;  %v864_v9 = vld [vmem:[#allocation2 + $0x124] ss:$8 sps:$4 sm:$0xff]   ;;  %v866_v10 = vld [vmem:[#allocation2 + $0x20] ss:$8 sps:$4 sm:$0xff]  }
  0x2a   :  { %502 = vmatprep.subr.bf16.mxu0 %v858_v5  ;;  %v867_v11 = vld [vmem:[#allocation2 + $0x120] ss:$8 sps:$4 sm:$0xff]   ;;  %v868_v12 = vld [vmem:[#allocation2 + $0x34] ss:$8 sps:$4 sm:$0xff]   ;;  %v872_v14 = vld [vmem:[#allocation2 + $0x30] ss:$8 sps:$4 sm:$0xff]  }
  0x2b   :  { %v870_v13 = vld [vmem:[#allocation2 + $0x134] ss:$8 sps:$4 sm:$0xff]   ;;  %v873_v15 = vld [vmem:[#allocation2 + $0x130] ss:$8 sps:$4 sm:$0xff]   ;;  %v874_v16 = vld [vmem:[#allocation2 + $0x44] ss:$8 sps:$4 sm:$0xff]  }
  0x2c   :  { %460 = vmatpush1.bf16.msra.mxu1 %v860_v6  ;;  %v876_v17 = vld [vmem:[#allocation2 + $0x144] ss:$8 sps:$4 sm:$0xff]   ;;  %v878_v18 = vld [vmem:[#allocation2 + $0x40] ss:$8 sps:$4 sm:$0xff]   ;;  %v880_v20 = vld [vmem:[#allocation2 + $0x54] ss:$8 sps:$4 sm:$0xff]  }
  0x2d   :  { %503 = vmatpush1.bf16.msra.mxu0 %v861_v7  ;;  %461 = vmatprep.subr.bf16.mxu1 %v862_v8  ;;  %v879_v19 = vld [vmem:[#allocation2 + $0x140] ss:$8 sps:$4 sm:$0xff]   ;;  %v882_v21 = vld [vmem:[#allocation2 + $0x154] ss:$8 sps:$4 sm:$0xff]   ;;  %v884_v22 = vld [vmem:[#allocation2 + $0x50] ss:$8 sps:$4 sm:$0xff]  }
  0x2e   :  { %504 = vmatprep.subr.bf16.mxu0 %v864_v9  ;;  %v885_v23 = vld [vmem:[#allocation2 + $0x150] ss:$8 sps:$4 sm:$0xff]   ;;  %v886_v24 = vld [vmem:[#allocation2 + $0x64] ss:$8 sps:$4 sm:$0xff]   ;;  %v890_v26 = vld [vmem:[#allocation2 + $0x60] ss:$8 sps:$4 sm:$0xff]  }
  0x2f   :  { %v888_v25 = vld [vmem:[#allocation2 + $0x164] ss:$8 sps:$4 sm:$0xff]   ;;  %v891_v27 = vld [vmem:[#allocation2 + $0x160] ss:$8 sps:$4 sm:$0xff]   ;;  %v892_v28 = vld [vmem:[#allocation2 + $0x74] ss:$8 sps:$4 sm:$0xff]  }
  0x30   :  { %462 = vmatpush1.bf16.msra.mxu1 %v866_v10  ;;  %v894_v29 = vld [vmem:[#allocation2 + $0x174] ss:$8 sps:$4 sm:$0xff]   ;;  %v896_v30 = vld [vmem:[#allocation2 + $0x70] ss:$8 sps:$4 sm:$0xff]   ;;  %v898_v32 = vld [vmem:[#allocation2 + $0x84] ss:$8 sps:$4 sm:$0xff]  }
  0x31   :  { %505 = vmatpush1.bf16.msra.mxu0 %v867_v11  ;;  %463 = vmatprep.subr.bf16.mxu1 %v868_v12  ;;  %v897_v31 = vld [vmem:[#allocation2 + $0x170] ss:$8 sps:$4 sm:$0xff]   ;;  %v900_v33 = vld [vmem:[#allocation2 + $0x184] ss:$8 sps:$4 sm:$0xff]   ;;  %v902_v34 = vld [vmem:[#allocation2 + $0x80] ss:$8 sps:$4 sm:$0xff]  }
  0x32   :  { %506 = vmatprep.subr.bf16.mxu0 %v870_v13  ;;  %v903_v35 = vld [vmem:[#allocation2 + $0x180] ss:$8 sps:$4 sm:$0xff]   ;;  %v904_v36 = vld [vmem:[#allocation2 + $0x94] ss:$8 sps:$4 sm:$0xff]   ;;  %v908_v38 = vld [vmem:[#allocation2 + $0x90] ss:$8 sps:$4 sm:$0xff]  }
  0x33   :  { %v906_v37 = vld [vmem:[#allocation2 + $0x194] ss:$8 sps:$4 sm:$0xff]   ;;  %v909_v39 = vld [vmem:[#allocation2 + $0x190] ss:$8 sps:$4 sm:$0xff]   ;;  %v910_v40 = vld [vmem:[#allocation2 + $0xa4] ss:$8 sps:$4 sm:$0xff]  }
  0x34   :  { %464 = vmatpush1.bf16.msra.mxu1 %v872_v14  ;;  %v912_v41 = vld [vmem:[#allocation2 + $0x1a4] ss:$8 sps:$4 sm:$0xff]   ;;  %v914_v42 = vld [vmem:[#allocation2 + $0xa0] ss:$8 sps:$4 sm:$0xff]   ;;  %v916_v44 = vld [vmem:[#allocation2 + $0xb4] ss:$8 sps:$4 sm:$0xff]  }
  0x35   :  { %507 = vmatpush1.bf16.msra.mxu0 %v873_v15  ;;  %465 = vmatprep.subr.bf16.mxu1 %v874_v16  ;;  %v915_v43 = vld [vmem:[#allocation2 + $0x1a0] ss:$8 sps:$4 sm:$0xff]   ;;  %v918_v45 = vld [vmem:[#allocation2 + $0x1b4] ss:$8 sps:$4 sm:$0xff]   ;;  %v920_v50 = vld [vmem:[#allocation2 + $0xb0] ss:$8 sps:$4 sm:$0xff]  }
  0x36   :  { %508 = vmatprep.subr.bf16.mxu0 %v876_v17  ;;  %v50_v46 = vld [vmem:[%s1106_s0 + $0x8] sm:$0xff]  ;;  %v52_v48 = vld [vmem:[%s1106_s0 + $0x18] sm:$0xff]  ;;  %v49_v6 = vld [vmem:[%s1106_s0] sm:$0xff] }
  0x37   :  { %v54_v47 = vld [vmem:[%s1106_s0 + $0x28] sm:$0xff]  ;;  %v56_v49 = vld [vmem:[%s1106_s0 + $0x38] sm:$0xff]  ;;  %v53_v7 = vld [vmem:[%s1106_s0 + $0x20] sm:$0xff] }
  0x38   :  { %466 = vmatpush1.bf16.msra.mxu1 %v878_v18  ;;  %v921_v51 = vld [vmem:[#allocation2 + $0x1b0] ss:$8 sps:$4 sm:$0xff]   ;;  %v922_v52 = vld [vmem:[#allocation2 + $0xc4] ss:$8 sps:$4 sm:$0xff]   ;;  %v58_v53 = vpack.c.bf16 %v54_v47, %v50_v46  ;;  %v60_v54 = vpack.c.bf16 %v56_v49, %v52_v48  ;;  %v926_v56 = vld [vmem:[#allocation2 + $0xc0] ss:$8 sps:$4 sm:$0xff]   ;;  %v57_v11 = vpack.c.bf16 %v53_v7, %v49_v6 }
  0x39   :  { %509 = vmatpush1.bf16.msra.mxu0 %v879_v19  ;;  %467 = vmatprep.subr.bf16.mxu1 %v880_v20  ;;  %v924_v55 = vld [vmem:[#allocation2 + $0x1c4] ss:$8 sps:$4 sm:$0xff]   ;;  %v927_v57 = vld [vmem:[#allocation2 + $0x1c0] ss:$8 sps:$4 sm:$0xff]   ;;  %v928_v58 = vld [vmem:[#allocation2 + $0xd4] ss:$8 sps:$4 sm:$0xff]  }
  0x3a   :  { %510 = vmatprep.subr.bf16.mxu0 %v882_v21  ;;  %489 = vmatprep.mubr.bf16.mxu1 %v58_v53  ;;  %v930_v59 = vld [vmem:[#allocation2 + $0x1d4] ss:$8 sps:$4 sm:$0xff]   ;;  %v932_v60 = vld [vmem:[#allocation2 + $0xd0] ss:$8 sps:$4 sm:$0xff]   ;;  %v934_v62 = vld [vmem:[#allocation2 + $0xe4] ss:$8 sps:$4 sm:$0xff]  }
  0x3b   :  { %532 = vmatprep.mubr.bf16.mxu0 %v60_v54  ;;  %v933_v61 = vld [vmem:[#allocation2 + $0x1d0] ss:$8 sps:$4 sm:$0xff]   ;;  %v936_v63 = vld [vmem:[#allocation2 + $0x1e4] ss:$8 sps:$4 sm:$0xff]   ;;  %v938_v0 = vld [vmem:[#allocation2 + $0xe0] ss:$8 sps:$4 sm:$0xff]  }
  0x3c   :  { %468 = vmatpush1.bf16.msra.mxu1 %v884_v22  ;;  %v939_v1 = vld [vmem:[#allocation2 + $0x1e0] ss:$8 sps:$4 sm:$0xff]   ;;  %v940_v2 = vld [vmem:[#allocation2 + $0xf4] ss:$8 sps:$4 sm:$0xff]   ;;  %v944_v4 = vld [vmem:[#allocation2 + $0xf0] ss:$8 sps:$4 sm:$0xff]  }
  0x3d   :  { %511 = vmatpush1.bf16.msra.mxu0 %v885_v23  ;;  %469 = vmatprep.subr.bf16.mxu1 %v886_v24  ;;  %v942_v3 = vld [vmem:[#allocation2 + $0x1f4] ss:$8 sps:$4 sm:$0xff]   ;;  %v945_v5 = vld [vmem:[#allocation2 + $0x1f0] ss:$8 sps:$4 sm:$0xff]   ;;  %v946_v10 = vld [vmem:[#allocation4 + $0x40] sm:$0xff]  }
  0x3e   :  { %512 = vmatprep.subr.bf16.mxu0 %v888_v25  ;;  %v51_v8 = vld [vmem:[%s1106_s0 + $0x10] sm:$0xff]  ;;  %v947_v13 = vld [vmem:[#allocation4] sm:$0xff]   ;;  %v948_v14 = vld [vmem:[#allocation4 + $0x48] sm:$0xff]  }
  0x3f   :  { %v55_v9 = vld [vmem:[%s1106_s0 + $0x30] sm:$0xff]  ;;  %v949_v15 = vld [vmem:[#allocation4 + $0x8] sm:$0xff]   ;;  %v952_v18 = vld [vmem:[#allocation4 + $0x58] sm:$0xff]  }
  0x40   :  { %470 = vmatpush1.bf16.msra.mxu1 %v890_v26  ;;  %v59_v12 = vpack.c.bf16 %v55_v9, %v51_v8  ;;  %v950_v16 = vld [vmem:[#allocation4 + $0x50] sm:$0xff]   ;;  %v953_v19 = vld [vmem:[#allocation4 + $0x18] sm:$0xff]   ;;  %v954_v20 = vld [vmem:[#allocation4 + $0x60] sm:$0xff]  }
  0x41   :  { %513 = vmatpush1.bf16.msra.mxu0 %v891_v27  ;;  %471 = vmatprep.subr.bf16.mxu1 %v892_v28  ;;  %v951_v17 = vld [vmem:[#allocation4 + $0x10] sm:$0xff]   ;;  %v955_v21 = vld [vmem:[#allocation4 + $0x20] sm:$0xff]   ;;  %v956_v22 = vld [vmem:[#allocation4 + $0x68] sm:$0xff]   ;;  %v127_v28 = vlaneseq }
  0x42   :  { %514 = vmatprep.subr.bf16.mxu0 %v894_v29  ;;  %v957_v23 = vld [vmem:[#allocation4 + $0x28] sm:$0xff]   ;;  %v958_v24 = vld [vmem:[#allocation4 + $0x70] sm:$0xff]   ;;  %v960_v26 = vld [vmem:[#allocation4 + $0x78] sm:$0xff]  }
  0x43   :  { %v959_v25 = vld [vmem:[#allocation4 + $0x30] sm:$0xff]   ;;  %v961_v27 = vld [vmem:[#allocation4 + $0x38] sm:$0xff]   ;;  %v128_v29 = vshrl.u32 %v127_v28, 7 }
  0x44   :  { %472 = vmatpush1.bf16.msra.mxu1 %v896_v30 }
  0x45   :  { %515 = vmatpush1.bf16.msra.mxu0 %v897_v31  ;;  %473 = vmatprep.subr.bf16.mxu1 %v898_v32  ;;  %v129_v30 = vsub.s32 0, %v128_v29  ;;  %v125_v31 = vld [vmem:[%s1108_s2] sm:$0x3]  ;;  %v133_v32 = vsub.s32 1, %v128_v29 }
  0x46   :  { %516 = vmatprep.subr.bf16.mxu0 %v900_v33 }
  0x47   :  { %v130_v33 = vrot.slane %v125_v31, %v129_v30 }
  0x48   :  { %474 = vmatpush1.bf16.msra.mxu1 %v902_v34  ;;  %v134_v34 = vrot.slane %v125_v31, %v133_v32 }
  0x49   :  { %517 = vmatpush1.bf16.msra.mxu0 %v903_v35  ;;  %475 = vmatprep.subr.bf16.mxu1 %v904_v36 }
  0x4a   :  { %518 = vmatprep.subr.bf16.mxu0 %v906_v37 }
  0x4c   :  { %476 = vmatpush1.bf16.msra.mxu1 %v908_v38 }
  0x4d   :  { %519 = vmatpush1.bf16.msra.mxu0 %v909_v39  ;;  %477 = vmatprep.subr.bf16.mxu1 %v910_v40 }
  0x4e   :  { %520 = vmatprep.subr.bf16.mxu0 %v912_v41 }
  0x50   :  { %478 = vmatpush1.bf16.msra.mxu1 %v914_v42 }
  0x51   :  { %521 = vmatpush1.bf16.msra.mxu0 %v915_v43  ;;  %479 = vmatprep.subr.bf16.mxu1 %v916_v44 }
  0x52   :  { %522 = vmatprep.subr.bf16.mxu0 %v918_v45 }
  0x54   :  { %480 = vmatpush1.bf16.msra.mxu1 %v920_v50 }
  0x55   :  { %523 = vmatpush1.bf16.msra.mxu0 %v921_v51  ;;  %481 = vmatprep.subr.bf16.mxu1 %v922_v52 }
  0x56   :  { %524 = vmatprep.subr.bf16.mxu0 %v924_v55 }
  0x58   :  { %482 = vmatpush1.bf16.msra.mxu1 %v926_v56 }
  0x59   :  { %525 = vmatpush1.bf16.msra.mxu0 %v927_v57  ;;  %483 = vmatprep.subr.bf16.mxu1 %v928_v58  ;;  %v797_v58 = vld [vmem:[%s1110_s4] ss:$0 sm:$0xff] }
  0x5a   :  { %526 = vmatprep.subr.bf16.mxu0 %v930_v59 }
  0x5c   :  { %484 = vmatpush1.bf16.msra.mxu1 %v932_v60 }
  0x5d   :  { %527 = vmatpush1.bf16.msra.mxu0 %v933_v61  ;;  %485 = vmatprep.subr.bf16.mxu1 %v934_v62 }
  0x5e   :  { %528 = vmatprep.subr.bf16.mxu0 %v936_v63 }
  0x60   :  { %486 = vmatpush1.bf16.msra.mxu1 %v938_v0 }
  0x61   :  { %529 = vmatpush1.bf16.msra.mxu0 %v939_v1  ;;  %487 = vmatprep.subr.bf16.mxu1 %v940_v2 }
  0x62   :  { %530 = vmatprep.subr.bf16.mxu0 %v942_v3 }
  0x64   :  { %488 = vmatpush1.bf16.msra.mxu1 %v944_v4 }
  0x65   :  { %531 = vmatpush1.bf16.msra.mxu0 %v945_v5  ;;  %814 = vmatprep.subr.bf16.mxu1 %v946_v10 }
  0x67   :  { %490 = vmatmul.mubr.bf16.vlgmr.msra.gmra.mrb[0].mxu1 %v57_v11 }
  0x68   :  { %533 = vmatmul.mubr.bf16.vlgmr.msra.gmra.mrb[0].mxu0 %v59_v12  ;;  %815 = vmatpush3.bf16.msra.mxu1 %v947_v13 }
  0x69   :  { %816 = vmatprep.subr.bf16.mxu1 %v948_v14 }
  0x6c   :  { %817 = vmatpush3.bf16.msra.mxu1 %v949_v15 }
  0x6d   :  { %818 = vmatprep.subr.bf16.mxu1 %v950_v16 }
  0x70   :  { %819 = vmatpush3.bf16.msra.mxu1 %v951_v17 }
  0x71   :  { %820 = vmatprep.subr.bf16.mxu1 %v952_v18 }
  0x74   :  { %821 = vmatpush3.bf16.msra.mxu1 %v953_v19 }
  0x75   :  { %822 = vmatprep.subr.bf16.mxu1 %v954_v20 }
  0x78   :  { %823 = vmatpush3.bf16.msra.mxu1 %v955_v21 }
  0x79   :  { %824 = vmatprep.subr.bf16.mxu1 %v956_v22 }
  0x7c   :  { %825 = vmatpush3.bf16.msra.mxu1 %v957_v23 }
  0x7d   :  { %826 = vmatprep.subr.bf16.mxu1 %v958_v24 }
  0x80   :  { %827 = vmatpush3.bf16.msra.mxu1 %v959_v25 }
  0x81   :  { %828 = vmatprep.subr.bf16.mxu1 %v960_v26 }
  0x84   :  { %829 = vmatpush3.bf16.msra.mxu1 %v961_v27 }
 0x13a   :  { %v491_v35 = vpop.f32.mrb[0].mxu1 }
 0x13b   :  { %v534_v36 = vpop.f32.mrb[0].mxu0  ;;  %v492_v37 = vadd.f32 %v491_v35, %v130_v33  ;;  %v493_v38 = vpop.f32.mrb[1].mxu1 }
 0x13c   :  { %v536_v39 = vpop.f32.mrb[1].mxu0  ;;  %v494_v40 = vadd.f32 %v493_v38, %v134_v34  ;;  %v495_v41 = vpop.f32.mrb[2].mxu1 }
 0x13d   :  { %v538_v42 = vpop.f32.mrb[2].mxu0  ;;  %v535_v43 = vadd.f32 %v534_v36, %v492_v37  ;;  %v496_v44 = vadd.f32 %v495_v41, %v130_v33  ;;  %v497_v45 = vpop.f32.mrb[3].mxu1 }
 0x13e   :  { %v540_v46 = vpop.f32.mrb[3].mxu0  ;;  %v537_v47 = vadd.f32 %v536_v39, %v494_v40  ;;  %v498_v48 = vadd.f32 %v497_v45, %v134_v34 }
 0x13f   :  { %v539_v49 = vadd.f32 %v538_v42, %v496_v44  ;;  %v543_v51 = vmax.f32 %v535_v43, 0.0 }
 0x140   :  { %v541_v50 = vadd.f32 %v540_v46, %v498_v48  ;;  %v544_v53 = vmax.f32 %v537_v47, 0.0 }
 0x141   :  { %v545_v52 = vmax.f32 %v539_v49, 0.0 }
 0x142   :  { %v546_v54 = vmax.f32 %v541_v50, 0.0 }
 0x143   :  { %v547_v55 = vpack.c.bf16 %v545_v52, %v543_v51 }
 0x144   :  { %v548_v56 = vpack.c.bf16 %v546_v54, %v544_v53 }
 0x146   :  { %716 = vmatprep.mubr.bf16.mxu1 %v548_v56 }
 0x147   :  { %717 = vmatmul.mubr.bf16.vlgmr.msra.gmra.mrb[4].mxu1 %v547_v55 }
 0x21a   :  { %v830_v57 = vpop.f32.mrb[4].mxu1 }
 0x21b   :  { %v831_v59 = vpop.f32.mrb[5].mxu1 }
 0x21c   :  { %v832_v60 = vadd.f32 %v831_v59, %v830_v57  ;;  %v833_v61 = vpop.f32.mrb[6].mxu1 }
 0x21d   :  { %v834_v62 = vpop.f32.mrb[7].mxu1 }
 0x21e   :  { %v719_v63 = vadd.f32 %v832_v60, %v797_v58  ;;  %v835_v0 = vadd.f32 %v834_v62, %v833_v61 }
 0x220   :  { %725 = vst [vmem:[%s1111_s5] sm:$0xff] %v719_v63  ;;  %v722_v1 = vadd.f32 %v835_v0, %v797_v58 }
 0x222   :  { %726 = vst [vmem:[%s1111_s5 + $0x8] sm:$0xff] %v722_v1 }
 0x223   :  { %731 = vsyncpa [#allocation3], 1 }
 0x224   :  { %732 = vsyncpa [#allocation5], 1 }

</bundles_post_ra>
